<compile_context>
chip_gen: v5e
topology: v5e:2x2
jax: 0.10.0
libtpu: 0.0.40
codegen_flags: <defaults>
</compile_context>

<pallas_src>
import functools

import numpy as np

import jax
import jax.numpy as jnp
from jax import lax
from jax.experimental import pallas as pl
from jax.experimental.pallas import tpu as pltpu

_VMEM_LIMIT = 48 * 1024 * 1024  # < v7x 64 MiB physical; fine on v5e/v6e (128 MiB)


def _round_up(x, m):
    return (x + m - 1) // m * m


def _pick_tile(padded, candidates):
    for c in candidates:
        if c <= padded and padded % c == 0:
            return c
    return candidates[-1]


# ----------------------------- Pallas kernels ------------------------------
def _conv_mm_kernel(*refs, act, has_res):
    # (TM,TK)bf16 @ (TK,TN)bf16 -> f32 acc ; epilogue: +bias (+residual) +act
    if has_res:
        x_ref, w_ref, b_ref, res_ref, o_ref, acc_ref = refs
    else:
        x_ref, w_ref, b_ref, o_ref, acc_ref = refs
        res_ref = None
    k = pl.program_id(2)

    @pl.when(k == 0)
    def _():
        acc_ref[...] = jnp.zeros_like(acc_ref)

    acc_ref[...] += jnp.dot(x_ref[...], w_ref[...],
                            preferred_element_type=jnp.float32)

    @pl.when(k == pl.num_programs(2) - 1)
    def _():
        acc = acc_ref[...] + b_ref[...]
        if has_res:
            acc = acc + res_ref[...]
        if act == "relu":
            acc = jnp.maximum(acc, 0.0)
        elif act == "elu":
            acc = jnp.where(acc > 0.0, acc,
                            jnp.exp(jnp.minimum(acc, 0.0)) - 1.0)
        elif act == "sigmoid":
            # numerically stable sigmoid (no inf intermediates)
            e = jnp.exp(-jnp.abs(acc))
            acc = jnp.where(acc >= 0.0, 1.0 / (1.0 + e), e / (1.0 + e))
        o_ref[...] = acc.astype(o_ref.dtype)


def _maxpool9_kernel(*refs):
    o_ref = refs[-1]
    m = refs[0][...]
    for r in refs[1:-1]:
        m = jnp.maximum(m, r[...])
    o_ref[...] = m


def _disp_to_depth_kernel(d_ref, o_ref, *, min_depth, max_depth):
    min_out = 1.0 / max_depth
    max_out = 1.0 / min_depth
    scaled = min_out + (max_out - min_out) * d_ref[...]
    o_ref[...] = 1.0 / scaled


# ----------------------------- Pallas wrappers ------------------------------
def _matmul_bias_act(patches, w2, b, res, act):
    m, k = patches.shape
    n = w2.shape[1]
    mp = _round_up(m, 8)
    kp = _round_up(k, 128)
    np_ = _round_up(n, 128)
    tm = _pick_tile(mp, (512, 256, 128, 64, 32, 16, 8))
    tk = _pick_tile(kp, (512, 256, 128))
    tn = _pick_tile(np_, (256, 128))

    x = jnp.pad(patches, ((0, mp - m), (0, kp - k))).astype(jnp.bfloat16)
    w = jnp.pad(w2, ((0, kp - k), (0, np_ - n))).astype(jnp.bfloat16)
    bb = jnp.pad(b, ((0, 0), (0, np_ - n))).astype(jnp.float32)

    in_specs = [
        pl.BlockSpec((tm, tk), lambda i, j, kk: (i, kk)),
        pl.BlockSpec((tk, tn), lambda i, j, kk: (kk, j)),
        pl.BlockSpec((1, tn), lambda i, j, kk: (0, j)),
    ]
    args = [x, w, bb]
    has_res = res is not None
    if has_res:
        r = jnp.pad(res, ((0, mp - m), (0, np_ - n))).astype(jnp.float32)
        in_specs.append(pl.BlockSpec((tm, tn), lambda i, j, kk: (i, j)))
        args.append(r)

    flops = 2 * mp * np_ * kp
    trans = mp * np_ if act in ("elu", "sigmoid") else 0
    bytes_acc = (mp * kp + kp * np_) * 2 + mp * np_ * 4 \
        + (mp * np_ * 4 if has_res else 0)

    out = pl.pallas_call(
        functools.partial(_conv_mm_kernel, act=act, has_res=has_res),
        out_shape=jax.ShapeDtypeStruct((mp, np_), jnp.float32),
        grid=(mp // tm, np_ // tn, kp // tk),
        in_specs=in_specs,
        out_specs=pl.BlockSpec((tm, tn), lambda i, j, kk: (i, j)),
        scratch_shapes=[pltpu.VMEM((tm, tn), jnp.float32)],
        compiler_params=pltpu.CompilerParams(
            dimension_semantics=("parallel", "parallel", "arbitrary"),
            vmem_limit_bytes=_VMEM_LIMIT),
        cost_estimate=pl.CostEstimate(flops=flops, transcendentals=trans,
                                      bytes_accessed=bytes_acc),
    )(*args)
    return out[:m, :n]


@functools.partial(jax.jit,
                   static_argnames=("kh", "kw", "stride", "pad", "pad_mode", "act"))
def conv2d_nhwc(x, w2, b, res=None, *, kh, kw, stride, pad, pad_mode, act):
    """x: (N,H,W,Cin); w2: (kh*kw*Cin, Cout) rows ordered (ki,kj,cin); b: (1,Cout).
    If `res` is given (same shape as the conv output) it is fused into the
    epilogue as a residual add before the activation."""
    n, h, w, c = x.shape
    if pad > 0:
        x = jnp.pad(x, ((0, 0), (pad, pad), (pad, pad), (0, 0)), mode=pad_mode)
    hp, wp = h + 2 * pad, w + 2 * pad
    oh = (hp - kh) // stride + 1
    ow = (wp - kw) // stride + 1
    # TODO(synk): fold im2col / upsample / concat gathers into the matmul's
    # BlockSpec index_map instead of materializing the patch matrix in HBM.
    cols = []
    for i in range(kh):
        for j in range(kw):
            cols.append(
                lax.slice(x, (0, i, j, 0),
                          (n, i + (oh - 1) * stride + 1,
                           j + (ow - 1) * stride + 1, c),
                          (1, stride, stride, 1)))
    patches = jnp.concatenate(cols, axis=-1).reshape(n * oh * ow, kh * kw * c)
    res2 = None if res is None else res.reshape(n * oh * ow, w2.shape[1])
    out = _matmul_bias_act(patches, w2, b, res2, act)
    return out.reshape(n, oh, ow, w2.shape[1])


@functools.partial(jax.jit, static_argnames=("k", "stride", "pad"))
def maxpool2d_nhwc(x, *, k, stride, pad):
    n, h, w, c = x.shape
    x = jnp.pad(x, ((0, 0), (pad, pad), (pad, pad), (0, 0)),
                mode="constant", constant_values=-1e30)
    oh = (h + 2 * pad - k) // stride + 1
    ow = (w + 2 * pad - k) // stride + 1
    m = n * oh * ow
    mp = _round_up(m, 8)
    tm = _pick_tile(mp, (1024, 512, 256, 128, 64, 32, 16, 8))
    taps = []
    for i in range(k):
        for j in range(k):
            t = lax.slice(x, (0, i, j, 0),
                          (n, i + (oh - 1) * stride + 1,
                           j + (ow - 1) * stride + 1, c),
                          (1, stride, stride, 1)).reshape(m, c)
            taps.append(jnp.pad(t, ((0, mp - m), (0, 0))))
    spec = pl.BlockSpec((tm, c), lambda i: (i, 0))
    out = pl.pallas_call(
        _maxpool9_kernel,
        out_shape=jax.ShapeDtypeStruct((mp, c), jnp.float32),
        grid=(mp // tm,),
        in_specs=[spec] * (k * k),
        out_specs=spec,
        compiler_params=pltpu.CompilerParams(
            dimension_semantics=("parallel",),
            vmem_limit_bytes=_VMEM_LIMIT),
    )(*taps)
    return out[:m].reshape(n, oh, ow, c)


@functools.partial(jax.jit, static_argnames=("min_depth", "max_depth"))
def output_to_depth(disp, min_depth, max_depth):
    shp = disp.shape
    total = int(np.prod(shp))
    lanes = 1024  # lane-dense last dim (large multiple of 128)
    tp = _round_up(total, lanes)
    flat = jnp.pad(disp.reshape(-1), (0, tp - total)).reshape(tp // lanes, lanes)
    out = pl.pallas_call(
        functools.partial(_disp_to_depth_kernel,
                          min_depth=float(min_depth), max_depth=float(max_depth)),
        out_shape=jax.ShapeDtypeStruct(flat.shape, jnp.float32),
        in_specs=[pl.BlockSpec(memory_space=pltpu.MemorySpace.VMEM)],
        out_specs=pl.BlockSpec(memory_space=pltpu.MemorySpace.VMEM),
        compiler_params=pltpu.CompilerParams(vmem_limit_bytes=_VMEM_LIMIT),
    )(flat)
    return out.reshape(-1)[:total].reshape(shp)


# ----------------------------- parameter setup ------------------------------
class _ParamGen:
    def __init__(self, seed):
        self.rng = np.random.default_rng(seed)


def _conv_weight(pg, cout, cin, k):
    fan_in = cin * k * k
    std = 0.2 * (2.0 / fan_in) ** 0.5
    return (std * pg.rng.standard_normal((cout, cin, k, k))).astype(np.float32)


def _bn_params(pg, c):
    gamma = (1.0 + 0.1 * pg.rng.standard_normal(c)).astype(np.float32)
    beta = (0.01 * pg.rng.standard_normal(c)).astype(np.float32)
    mean = (0.01 * pg.rng.standard_normal(c)).astype(np.float32)
    var = (1.0 + 0.1 * pg.rng.random(c)).astype(np.float32)
    return gamma, beta, mean, var


def _fold_conv_bn(w, bnp, eps=1e-5):
    # eval-mode BatchNorm folded into the (bias-free) conv: y = conv(x)*s + (beta - mean*s)
    gamma, beta, mean, var = bnp
    s = gamma / np.sqrt(var + eps)
    wf = w * s[:, None, None, None]
    cout, cin, kh, kw = w.shape
    w2 = np.transpose(wf, (2, 3, 1, 0)).reshape(kh * kw * cin, cout)
    bf = (beta - mean * s).reshape(1, cout)
    return jnp.asarray(w2), jnp.asarray(bf)


def _init_conv_bn(pg, cin, cout, k):
    return _fold_conv_bn(_conv_weight(pg, cout, cin, k), _bn_params(pg, cout))


def _init_conv_bias(pg, cin, cout, k):
    w = _conv_weight(pg, cout, cin, k)
    b = (0.01 * pg.rng.standard_normal(cout)).astype(np.float32)
    w2 = np.transpose(w, (2, 3, 1, 0)).reshape(k * k * cin, cout)
    return jnp.asarray(w2), jnp.asarray(b.reshape(1, cout))


def build_encoder_params(pg):
    # torchvision ResNet-152 bottleneck config: layers = [3, 8, 36, 3]
    ep = {"conv1": _init_conv_bn(pg, 3, 64, 7)}
    cfg = [(64, 3, 1), (128, 8, 2), (256, 36, 2), (512, 3, 2)]
    inplanes = 64
    layers = []
    for planes, nblocks, stride in cfg:
        layer = []
        for bi in range(nblocks):
            s = stride if bi == 0 else 1
            blk = {
                "c1": _init_conv_bn(pg, inplanes, planes, 1),
                "c2": _init_conv_bn(pg, planes, planes, 3),
                "c3": _init_conv_bn(pg, planes, planes * 4, 1),
                "stride": s,
            }
            if bi == 0 and (s != 1 or inplanes != planes * 4):
                blk["down"] = _init_conv_bn(pg, inplanes, planes * 4, 1)
            layer.append(blk)
            inplanes = planes * 4
        layers.append(layer)
    ep["layers"] = layers
    return ep


def build_decoder_params(pg, num_ch_enc, num_ch_dec):
    dp = {}
    for i in range(4, -1, -1):
        cin = num_ch_enc[-1] if i == 4 else num_ch_dec[i + 1]
        dp[("upconv", i, 0)] = _init_conv_bias(pg, cin, num_ch_dec[i], 3)
        cin = num_ch_dec[i] + (num_ch_enc[i - 1] if i > 0 else 0)
        dp[("upconv", i, 1)] = _init_conv_bias(pg, cin, num_ch_dec[i], 3)
    for s in range(4):
        dp[("dispconv", s)] = _init_conv_bias(pg, num_ch_dec[s], 1, 3)
    return dp


# ----------------------------- forward passes -------------------------------
def bottleneck_forward(x, blk):
    w2, b = blk["c1"]
    out = conv2d_nhwc(x, w2, b, kh=1, kw=1, stride=1, pad=0,
                      pad_mode="constant", act="relu")
    w2, b = blk["c2"]
    out = conv2d_nhwc(out, w2, b, kh=3, kw=3, stride=blk["stride"], pad=1,
                      pad_mode="constant", act="relu")
    if "down" in blk:
        w2d, bd = blk["down"]
        identity = conv2d_nhwc(x, w2d, bd, kh=1, kw=1, stride=blk["stride"],
                               pad=0, pad_mode="constant", act="none")
    else:
        identity = x
    # residual add + ReLU fused into the c3 conv epilogue
    w2, b = blk["c3"]
    return conv2d_nhwc(out, w2, b, identity, kh=1, kw=1, stride=1, pad=0,
                       pad_mode="constant", act="relu")


def encoder_forward(x_nchw, ep):
    x = jnp.transpose(x_nchw, (0, 2, 3, 1)).astype(jnp.float32)  # NCHW -> NHWC
    x = (x - 0.45) / 0.225                                        # ResnetEncoder normalization
    features = []
    w2, b = ep["conv1"]
    x = conv2d_nhwc(x, w2, b, kh=7, kw=7, stride=2, pad=3,
                    pad_mode="constant", act="relu")
    features.append(x)
    x = maxpool2d_nhwc(x, k=3, stride=2, pad=1)
    for layer in ep["layers"]:
        for blk in layer:
            x = bottleneck_forward(x, blk)
        features.append(x)
    return features


def _upsample2x(x):  # nearest-neighbour, scale_factor=2
    # TODO(synk): fold the 2x nearest upsample + skip concat into the following
    # conv's patch gather instead of materializing the 4x tensor in HBM.
    return jnp.repeat(jnp.repeat(x, 2, axis=1), 2, axis=2)


def decoder_forward(features, dp):
    outputs = {}
    x = features[-1]
    for i in range(4, -1, -1):
        w2, b = dp[("upconv", i, 0)]
        x = conv2d_nhwc(x, w2, b, kh=3, kw=3, stride=1, pad=1,
                        pad_mode="reflect", act="elu")
        x = _upsample2x(x)
        if i > 0:
            x = jnp.concatenate([x, features[i - 1]], axis=-1)
        w2, b = dp[("upconv", i, 1)]
        x = conv2d_nhwc(x, w2, b, kh=3, kw=3, stride=1, pad=1,
                        pad_mode="reflect", act="elu")
        if i in range(4):  # scales = range(4)
            w2, b = dp[("dispconv", i)]
            outputs[("out", i)] = conv2d_nhwc(x, w2, b, kh=3, kw=3, stride=1,
                                              pad=1, pad_mode="reflect",
                                              act="sigmoid")
    return outputs


class DistDepth:
    """JAX/Pallas port of DistDepth.forward (synthetic deterministic weights)."""

    def __init__(self, seed=42):
        pg = _ParamGen(seed)
        self.num_ch_enc = [64, 256, 512, 1024, 2048]
        self.num_ch_dec = [16, 32, 64, 128, 256]
        self.enc = build_encoder_params(pg)
        self.dec = build_decoder_params(pg, self.num_ch_enc, self.num_ch_dec)

    def __call__(self, input_image_nchw):
        features = encoder_forward(input_image_nchw, self.enc)
        outputs = decoder_forward(features, self.dec)
        disp = outputs[("out", 0)]                  # NHWC (N, H, W, 1)
        depth = output_to_depth(disp, 0.1, 10)      # 1 / (0.1 + 9.9 * disp)
        return jnp.transpose(depth, (0, 3, 1, 2))   # back to NCHW (N, 1, H, W)


if __name__ == "__main__":
    model = DistDepth(seed=42)
    key = jax.random.PRNGKey(0)
    # smallest spatial size compatible with the 5-level encoder + reflection-padded decoder
    x = jax.random.uniform(key, (2, 3, 64, 64), dtype=jnp.float32)  # NCHW like PyTorch
    depth = model(x)
    depth = jax.block_until_ready(depth)
    assert depth.shape == (2, 1, 64, 64), depth.shape
    assert bool(jnp.all(jnp.isfinite(depth)))
    print("KERNEL_OK")
</pallas_src>

<mosaic_0001>
module attributes {stable_mosaic.version = 11 : i64} {
  func.func @_conv_mm_kernel(%arg0: i32, %arg1: i32, %arg2: i32, %arg3: memref<512x256xbf16, #tpu.memory_space<vmem>>, %arg4: memref<256x128xbf16, #tpu.memory_space<vmem>>, %arg5: memref<1x128xf32, #tpu.memory_space<vmem>>, %arg6: memref<512x128xf32, #tpu.memory_space<vmem>>, %arg7: memref<512x128xf32, #tpu.memory_space<vmem>>) attributes {dimension_semantics = [#tpu.dimension_semantics<parallel>, #tpu.dimension_semantics<parallel>, #tpu.dimension_semantics<arbitrary>], iteration_bounds = array<i64: 4, 1, 1>, scalar_prefetch = 0 : i64, scratch_operands = 1 : i64, tpu.core_type = #tpu.core_type<tc>, window_params = [{transform_indices = @transform_0, window_bounds = array<i64: 512, 256>}, {transform_indices = @transform_1, window_bounds = array<i64: 256, 128>}, {transform_indices = @transform_2, window_bounds = array<i64: 1, 128>}, {transform_indices = @transform_3, window_bounds = array<i64: 512, 128>}]} {
    %c0_i32 = arith.constant 0 : i32
    %0 = arith.cmpi eq, %arg2, %c0_i32 : i32
    %1 = arith.extui %0 : i1 to i32
    %c0_i32_0 = arith.constant 0 : i32
    %2 = arith.cmpi ne, %1, %c0_i32_0 : i32
    scf.if %2 {
      %cst_10 = arith.constant 0.000000e+00 : f32
      %12 = vector.broadcast %cst_10 : f32 to vector<512x128xf32>
      %c0_11 = arith.constant 0 : index
      %c0_12 = arith.constant 0 : index
      %13 = vector.load %arg7[%c0_11, %c0_12] : memref<512x128xf32, #tpu.memory_space<vmem>>, vector<512x128xf32>
      tpu.vector_store %arg7[%c0_11, %c0_12], %12 {strides = array<i32>} : memref<512x128xf32, #tpu.memory_space<vmem>>, vector<512x128xf32>,
    } else {
    }
    %c0 = arith.constant 0 : index
    %c0_1 = arith.constant 0 : index
    %3 = vector.load %arg7[%c0, %c0_1] : memref<512x128xf32, #tpu.memory_space<vmem>>, vector<512x128xf32>
    %c0_2 = arith.constant 0 : index
    %c0_3 = arith.constant 0 : index
    %4 = vector.load %arg3[%c0_2, %c0_3] : memref<512x256xbf16, #tpu.memory_space<vmem>>, vector<512x256xbf16>
    %c0_4 = arith.constant 0 : index
    %c0_5 = arith.constant 0 : index
    %5 = vector.load %arg4[%c0_4, %c0_5] : memref<256x128xbf16, #tpu.memory_space<vmem>>, vector<256x128xbf16>
    %cst = arith.constant dense<0.000000e+00> : vector<512x128xf32>
    %6 = tpu.matmul %4, %5, %cst {dimension_numbers = #tpu.dot_dimension_numbers<[1], [0], [0], [1], [0, 0, 1, 1], [], []>} : vector<512x256xbf16>, vector<256x128xbf16>, vector<512x128xf32> -> vector<512x128xf32>
    %7 = arith.addf %3, %6 : vector<512x128xf32>
    %c0_6 = arith.constant 0 : index
    %c0_7 = arith.constant 0 : index
    %8 = vector.load %arg7[%c0_6, %c0_7] : memref<512x128xf32, #tpu.memory_space<vmem>>, vector<512x128xf32>
    tpu.vector_store %arg7[%c0_6, %c0_7], %7 {strides = array<i32>} : memref<512x128xf32, #tpu.memory_space<vmem>>, vector<512x128xf32>,
    %c0_i32_8 = arith.constant 0 : i32
    %9 = arith.cmpi eq, %arg2, %c0_i32_8 : i32
    %10 = arith.extui %9 : i1 to i32
    %c0_i32_9 = arith.constant 0 : i32
    %11 = arith.cmpi ne, %10, %c0_i32_9 : i32
    scf.if %11 {
      %c0_10 = arith.constant 0 : index
      %c0_11 = arith.constant 0 : index
      %12 = vector.load %arg7[%c0_10, %c0_11] : memref<512x128xf32, #tpu.memory_space<vmem>>, vector<512x128xf32>
      %c0_12 = arith.constant 0 : index
      %c0_13 = arith.constant 0 : index
      %13 = vector.load %arg5[%c0_12, %c0_13] : memref<1x128xf32, #tpu.memory_space<vmem>>, vector<1x128xf32>
      %14 = vector.broadcast %13 : vector<1x128xf32> to vector<512x128xf32>
      %15 = arith.addf %12, %14 : vector<512x128xf32>
      %cst_14 = arith.constant 0.000000e+00 : f32
      %16 = vector.broadcast %cst_14 : f32 to vector<512x128xf32>
      %17 = arith.maximumf %15, %16 : vector<512x128xf32>
      %c0_15 = arith.constant 0 : index
      %c0_16 = arith.constant 0 : index
      %18 = vector.load %arg6[%c0_15, %c0_16] : memref<512x128xf32, #tpu.memory_space<vmem>>, vector<512x128xf32>
      tpu.vector_store %arg6[%c0_15, %c0_16], %17 {strides = array<i32>} : memref<512x128xf32, #tpu.memory_space<vmem>>, vector<512x128xf32>,
    } else {
    }
    return
  }
  func.func @transform_0(%arg0: i32, %arg1: i32, %arg2: i32) -> (i32, i32) {
    %c0_i32 = arith.constant 0 : i32
    return %arg0, %arg2 : i32, i32
  }
  func.func @transform_1(%arg0: i32, %arg1: i32, %arg2: i32) -> (i32, i32) {
    %c0_i32 = arith.constant 0 : i32
    return %arg2, %arg1 : i32, i32
  }
  func.func @transform_2(%arg0: i32, %arg1: i32, %arg2: i32) -> (i32, i32) {
    %c0_i32 = arith.constant 0 : i32
    %c0_i32_0 = arith.constant 0 : i32
    return %c0_i32, %arg1 : i32, i32
  }
  func.func @transform_3(%arg0: i32, %arg1: i32, %arg2: i32) -> (i32, i32) {
    %c0_i32 = arith.constant 0 : i32
    return %arg0, %arg1 : i32, i32
  }
}

</mosaic_0001>

<bundles_post_ra>
// kernel: conv2d_nhwc.1
= control target key start
LH: loop header
LB: loop body
LE: loop exit
PB: predicated region body
PF: predicated region fallthrough
CT: control target
= control target key end

     0   :  { %8 = vsyncpa [#allocation4], 0  ;;  %s2768_s0 = inlined_call_operand.vmem [shape: bf16[2048,256], index: 0, kind: input, shape index: {}]   ;;  %s2769_s1 = inlined_call_operand.vmem [shape: bf16[256,128], index: 1, kind: input, shape index: {}]   ;;  %s2770_s2 = inlined_call_operand.vmem [shape: f32[1,128], index: 2, kind: input, shape index: {}]   ;;  %s2771_s3 = inlined_call_operand.hbm [shape: f32[2048,128], index: 3, kind: output, shape index: {}]  }
   0x1   :  { %10 = vsyncpa [#allocation4 + $0x1], 0  ;;  %s2354_s12 = smov 0   ;;  %s2356_s13 = smov 0  }
   0x2   :  { %s2358_s14 = smov 0   ;;  %s2360_s15 = smov 0  }
   0x3   :  { %s2362_s16 = smov 0   ;;  %s2364_s17 = smov 0  }
   0x4 LB: > { %s1760_s18 = sadd.s32 4294967295, %s2330_s17   ;;  %s1761_s19 = sadd.s32 4294967294, %s2330_s17   ;;  %s2330_s17 = sphi %s2364_s17, %s16_s17   ;;  %s2326_s16 = sphi %s2362_s16, %s2778_s16   ;;  %s2322_s15 = sphi %s2360_s15, %s2777_s15   ;;  %s2318_s14 = sphi %s2358_s14, %s2776_s14   ;;  %s2314_s13 = sphi %s2356_s13, %s2775_s13   ;;  %s2310_s12 = sphi %s2354_s12, %s2774_s12  }
   0x5   : > { %s35_s20 = sadd.s32 1, %s2326_s16  ;;  %s126_s21 = sadd.s32 1, %s2318_s14 }
   0x6   : > { %p37_p0 = scmp.ge.s32.totalorder %s35_s20, 4  ;;  %p136_p1 = scmp.ne.s32.totalorder %s2318_s14, %s2314_s13 }
   0x7   : > { %p137_p2 = scmp.eq.s32.totalorder %s1760_s18, 3  ;;  %p142_p3 = scmp.ne.s32.totalorder %s2314_s13, %s2310_s12 }
   0x8   : > { %s2780_s20 = smov (%p37_p0, %s35_s20), 0  ;;  %p143_p5 = scmp.eq.s32.totalorder %s1761_s19, 3 }
   0x9   : > { %p2394_p4 = por %p137_p2, %p136_p1  ;;  %s121_s23 = ssub.s32 %s2326_s16, %s2780_s20 }
   0xa   : > { %p1766_p6 = scmp.ge.s32.totalorder %s2330_s17, 1  ;;  %p124_p7 = scmp.eq.s32.totalorder %s121_s23, 0 }
   0xb   : > { %p2401_p8 = por %p143_p5, %p142_p3  ;;  %p194_p9 = scmp.lt.s32.totalorder %s2330_s17, 5 }
   0xc   : > { %s2407_s25 = scalar_select %p124_p7, %s2318_s14, %s126_s21  }
   0xd   : > { %p195_p10 = pnand %p1766_p6, %p194_p9 }
   0xe   : > { %s1768_s11 = sshll.u32 (!%p195_p10), %s2322_s15, 6  ;;  %s231_s29 = sand.u32 (!%p195_p10), 1, %s2314_s13  }
   0xf   : > { %198 = sbr.rel (%p195_p10) target bundleno = 443 (0x1bb), region = 32  ;;  %p236_p11 = scmp.lt.s32.totalorder (!%p195_p10), %s1768_s11, 255 }
  0x10   : > { %s1767_s5 = sshll.u32 (!%p195_p10), %s231_s29, 9  ;;  %s2272_s27 = scalar_lea.hbm (!%p195_p10), %s2771_s3, 2048 }
  0x11   : > { %s2544_s6 = scalar_lea.vmem (!%p195_p10), [#allocation3], %s1767_s5 }
  0x12   : > { %s1646_s18 = sshll.u32 (!%p195_p10), %s2544_s6, 4  ;;  %s1647_s18 = int_to_ptr.vmem [resolvable:$true] %s1646_s18 }
  0x14   : > { %v2168_v0 = vld [vmem:[%s2769_s1 + $0x38] sm:$0xff]  ;;  %v2167_v2 = vld [vmem:[%s2769_s1 + $0x30] sm:$0xff]  ;;  %v2166_v4 = vld [vmem:[%s2769_s1 + $0x28] sm:$0xff]  ;;  %s2782_s11 = smov (!%p236_p11, %s1768_s11), 255 }
  0x15   : > { %v2176_v1 = vld [vmem:[%s2769_s1 + $0x78] sm:$0xff]  ;;  %903 = vmatpush.bf16.msra.mxu0 %v2168_v0  ;;  %2178 = vmatpush.bf16.msra.mxu2 %v2168_v0  ;;  %v2175_v3 = vld [vmem:[%s2769_s1 + $0x70] sm:$0xff]  ;;  %v2174_v5 = vld [vmem:[%s2769_s1 + $0x68] sm:$0xff]  ;;  %s2096_s7 = sshll.u32 %s2782_s11, 3 }
  0x16   : > { %1072 = vmatpush.bf16.msra.mxu1 %v2176_v1  ;;  %2186 = vmatpush.bf16.msra.mxu3 %v2176_v1  ;;  %v2165_v6 = vld [vmem:[%s2769_s1 + $0x20] sm:$0xff]  ;;  %v2164_v8 = vld [vmem:[%s2769_s1 + $0x18] sm:$0xff]  ;;  %v2163_v10 = vld [vmem:[%s2769_s1 + $0x10] sm:$0xff]  ;;  %s2452_s19 = scalar_lea.vmem %s2768_s0, %s2096_s7  ;;  %s2177_s7 = sshll.u32 %s2322_s15, 9 }
  0x17   : > { %v2173_v7 = vld [vmem:[%s2769_s1 + $0x60] sm:$0xff]  ;;  %v2172_v9 = vld [vmem:[%s2769_s1 + $0x58] sm:$0xff]  ;;  %v2171_v11 = vld [vmem:[%s2769_s1 + $0x50] sm:$0xff]  ;;  %s1645_s10 = scalar_lea.hbm %s2771_s3, %s2177_s7  ;;  %s1633_s15 = scalar_lea.sflag [#allocation4], %s231_s29 }
  0x18   : > { %v2162_v12 = vld [vmem:[%s2769_s1 + $0x8] sm:$0xff]  ;;  %v2161_v14 = vld [vmem:[%s2769_s1] sm:$0xff]  ;;  %v1781_v28 = vld [vmem:[%s2452_s19 + $0x10] sm:$0xf] }
  0x19   : > { %904 = vmatpush.bf16.msra.mxu0 %v2167_v2  ;;  %2179 = vmatpush.bf16.msra.mxu2 %v2167_v2  ;;  %v2170_v13 = vld [vmem:[%s2769_s1 + $0x48] sm:$0xff]  ;;  %v2169_v15 = vld [vmem:[%s2769_s1 + $0x40] sm:$0xff]  ;;  %v2100_v29 = vld [vmem:[%s2452_s19 + $0x14] sm:$0xf0] }
  0x1a   : > { %1073 = vmatpush.bf16.msra.mxu1 %v2175_v3  ;;  %2187 = vmatpush.bf16.msra.mxu3 %v2175_v3  ;;  %v1773_v16 = vld [vmem:[%s2452_s19] sm:$0xf]  ;;  %v2098_v17 = vld [vmem:[%s2452_s19 + $0x4] sm:$0xf0]  ;;  %v2097_v20 = vld [vmem:[%s2452_s19 + $0x4] sm:$0xf]  ;;  %v1782_v36 = vor.u32 %v2100_v29, %v1781_v28 }
  0x1b   : > { %v1901_v18 = vld [vmem:[%s2452_s19 + $0x100] sm:$0xf]  ;;  %v2130_v19 = vld [vmem:[%s2452_s19 + $0x104] sm:$0xf0]  ;;  %v1775_v21 = vld [vmem:[%s2452_s19 + $0x8] sm:$0xf0]  ;;  %v1774_v24 = vor.u32 %v2098_v17, %v1773_v16 }
  0x1c   : > { %v2129_v22 = vld [vmem:[%s2452_s19 + $0x104] sm:$0xf]  ;;  %v1903_v23 = vld [vmem:[%s2452_s19 + $0x108] sm:$0xf0]  ;;  %v1902_v25 = vor.u32 %v2130_v19, %v1901_v18  ;;  %v1778_v26 = vor.u32 %v2097_v20, %v1775_v21  ;;  %v1909_v30 = vld [vmem:[%s2452_s19 + $0x110] sm:$0xf] }
  0x1d   : > { %905 = vmatpush.bf16.msra.mxu0 %v2166_v4  ;;  %2180 = vmatpush.bf16.msra.mxu2 %v2166_v4  ;;  %v1906_v27 = vor.u32 %v2129_v22, %v1903_v23  ;;  %v2132_v31 = vld [vmem:[%s2452_s19 + $0x114] sm:$0xf0]  ;;  %v2099_v32 = vld [vmem:[%s2452_s19 + $0x14] sm:$0xf]  ;;  %v1783_v33 = vld [vmem:[%s2452_s19 + $0x18] sm:$0xf0] }
  0x1e   : > { %1074 = vmatpush.bf16.msra.mxu1 %v2174_v5  ;;  %2188 = vmatpush.bf16.msra.mxu3 %v2174_v5  ;;  %v2131_v34 = vld [vmem:[%s2452_s19 + $0x114] sm:$0xf]  ;;  %v1911_v35 = vld [vmem:[%s2452_s19 + $0x118] sm:$0xf0]  ;;  %v1910_v37 = vor.u32 %v2132_v31, %v1909_v30  ;;  %v1786_v38 = vor.u32 %v2099_v32, %v1783_v33  ;;  %v1789_v40 = vld [vmem:[%s2452_s19 + $0x20] sm:$0xf] }
  0x1f   : > { %v1914_v39 = vor.u32 %v2131_v34, %v1911_v35  ;;  %v2102_v41 = vld [vmem:[%s2452_s19 + $0x24] sm:$0xf0]  ;;  %v1917_v42 = vld [vmem:[%s2452_s19 + $0x120] sm:$0xf]  ;;  %v2101_v44 = vld [vmem:[%s2452_s19 + $0x24] sm:$0xf] }
  0x20   : > { %v2134_v43 = vld [vmem:[%s2452_s19 + $0x124] sm:$0xf0]  ;;  %v1791_v45 = vld [vmem:[%s2452_s19 + $0x28] sm:$0xf0]  ;;  %v2133_v46 = vld [vmem:[%s2452_s19 + $0x124] sm:$0xf]  ;;  %v1790_v48 = vor.u32 %v2102_v41, %v1789_v40 }
  0x21   : > { %906 = vmatpush.bf16.msra.mxu0 %v2165_v6  ;;  %2181 = vmatpush.bf16.msra.mxu2 %v2165_v6  ;;  %v1919_v47 = vld [vmem:[%s2452_s19 + $0x128] sm:$0xf0]  ;;  %v1918_v49 = vor.u32 %v2134_v43, %v1917_v42  ;;  %v1794_v50 = vor.u32 %v2101_v44, %v1791_v45  ;;  %v1797_v52 = vld [vmem:[%s2452_s19 + $0x30] sm:$0xf]  ;;  %v2104_v53 = vld [vmem:[%s2452_s19 + $0x34] sm:$0xf0] }
  0x22   : > { %1075 = vmatpush.bf16.msra.mxu1 %v2173_v7  ;;  %2189 = vmatpush.bf16.msra.mxu3 %v2173_v7  ;;  %v1922_v51 = vor.u32 %v2133_v46, %v1919_v47  ;;  %v1925_v54 = vld [vmem:[%s2452_s19 + $0x130] sm:$0xf]  ;;  %v2136_v55 = vld [vmem:[%s2452_s19 + $0x134] sm:$0xf0]  ;;  %v2103_v56 = vld [vmem:[%s2452_s19 + $0x34] sm:$0xf]  ;;  %v1798_v60 = vor.u32 %v2104_v53, %v1797_v52 }
  0x23   : > { %v1799_v57 = vld [vmem:[%s2452_s19 + $0x38] sm:$0xf0]  ;;  %v2135_v58 = vld [vmem:[%s2452_s19 + $0x134] sm:$0xf]  ;;  %v1926_v61 = vor.u32 %v2136_v55, %v1925_v54  ;;  %v1805_v0 = vld [vmem:[%s2452_s19 + $0x40] sm:$0xf] }
  0x24   : > { %v1927_v59 = vld [vmem:[%s2452_s19 + $0x138] sm:$0xf0]  ;;  %v1802_v62 = vor.u32 %v2103_v56, %v1799_v57  ;;  %v2106_v1 = vld [vmem:[%s2452_s19 + $0x44] sm:$0xf0]  ;;  %v1933_v2 = vld [vmem:[%s2452_s19 + $0x140] sm:$0xf] }
  0x25   : > { %907 = vmatpush.bf16.msra.mxu0 %v2164_v8  ;;  %2182 = vmatpush.bf16.msra.mxu2 %v2164_v8  ;;  %v1930_v63 = vor.u32 %v2135_v58, %v1927_v59  ;;  %v2138_v3 = vld [vmem:[%s2452_s19 + $0x144] sm:$0xf0]  ;;  %v2105_v4 = vld [vmem:[%s2452_s19 + $0x44] sm:$0xf]  ;;  %v1807_v5 = vld [vmem:[%s2452_s19 + $0x48] sm:$0xf0]  ;;  %v1806_v8 = vor.u32 %v2106_v1, %v1805_v0 }
  0x26   : > { %1076 = vmatpush.bf16.msra.mxu1 %v2172_v9  ;;  %2190 = vmatpush.bf16.msra.mxu3 %v2172_v9  ;;  %v2137_v6 = vld [vmem:[%s2452_s19 + $0x144] sm:$0xf]  ;;  %v1935_v7 = vld [vmem:[%s2452_s19 + $0x148] sm:$0xf0]  ;;  %v1934_v9 = vor.u32 %v2138_v3, %v1933_v2  ;;  %v2107_v16 = vld [vmem:[%s2452_s19 + $0x54] sm:$0xf] }
  0x27   : > { %v1815_v17 = vld [vmem:[%s2452_s19 + $0x58] sm:$0xf0]  ;;  %v2139_v18 = vld [vmem:[%s2452_s19 + $0x154] sm:$0xf]  ;;  %v2109_v28 = vld [vmem:[%s2452_s19 + $0x64] sm:$0xf] }
  0x28   : > { %v1943_v19 = vld [vmem:[%s2452_s19 + $0x158] sm:$0xf0]  ;;  %v1818_v22 = vor.u32 %v2107_v16, %v1815_v17  ;;  %v1823_v29 = vld [vmem:[%s2452_s19 + $0x68] sm:$0xf0]  ;;  %v2141_v30 = vld [vmem:[%s2452_s19 + $0x164] sm:$0xf] }
  0x29   : > { %908 = vmatpush.bf16.msra.mxu0 %v2163_v10  ;;  %2183 = vmatpush.bf16.msra.mxu2 %v2163_v10  ;;  %v1810_v10 = vor.u32 %v2105_v4, %v1807_v5  ;;  %v1946_v23 = vor.u32 %v2139_v18, %v1943_v19  ;;  %v1951_v31 = vld [vmem:[%s2452_s19 + $0x168] sm:$0xf0]  ;;  %v1826_v34 = vor.u32 %v2109_v28, %v1823_v29  ;;  %v2111_v40 = vld [vmem:[%s2452_s19 + $0x74] sm:$0xf]  ;;  %v1831_v41 = vld [vmem:[%s2452_s19 + $0x78] sm:$0xf0] }
  0x2a   : > { %1077 = vmatpush.bf16.msra.mxu1 %v2171_v11  ;;  %2191 = vmatpush.bf16.msra.mxu3 %v2171_v11  ;;  %v1938_v11 = vor.u32 %v2137_v6, %v1935_v7  ;;  %v1954_v35 = vor.u32 %v2141_v30, %v1951_v31  ;;  %v2143_v42 = vld [vmem:[%s2452_s19 + $0x174] sm:$0xf]  ;;  %v1959_v43 = vld [vmem:[%s2452_s19 + $0x178] sm:$0xf0]  ;;  %v1834_v46 = vor.u32 %v2111_v40, %v1831_v41  ;;  %v2113_v52 = vld [vmem:[%s2452_s19 + $0x84] sm:$0xf] }
  0x2b   : > { %v1962_v47 = vor.u32 %v2143_v42, %v1959_v43  ;;  %v1839_v53 = vld [vmem:[%s2452_s19 + $0x88] sm:$0xf0]  ;;  %v2145_v54 = vld [vmem:[%s2452_s19 + $0x184] sm:$0xf]  ;;  %v2539_v59 = vld [vmem:[%s2770_s2] ss:$0 sm:$0xff] }
  0x2c   : > { %v1967_v55 = vld [vmem:[%s2452_s19 + $0x188] sm:$0xf0]  ;;  %v1847_v16 = vld [vmem:[%s2452_s19 + $0x98] sm:$0xf0]  ;;  %v2147_v17 = vld [vmem:[%s2452_s19 + $0x194] sm:$0xf] }
  0x2d   : > { %909 = vmatpush.bf16.msra.mxu0 %v2162_v12  ;;  %2184 = vmatpush.bf16.msra.mxu2 %v2162_v12  ;;  %v1813_v12 = vld [vmem:[%s2452_s19 + $0x50] sm:$0xf]  ;;  %v1975_v18 = vld [vmem:[%s2452_s19 + $0x198] sm:$0xf0]  ;;  %v1853_v41 = vld [vmem:[%s2452_s19 + $0xa0] sm:$0xf] }
  0x2e   : > { %1078 = vmatpush.bf16.msra.mxu1 %v2170_v13  ;;  %2192 = vmatpush.bf16.msra.mxu3 %v2170_v13  ;;  %v2108_v13 = vld [vmem:[%s2452_s19 + $0x54] sm:$0xf0]  ;;  %v2118_v42 = vld [vmem:[%s2452_s19 + $0xa4] sm:$0xf0]  ;;  %v1981_v43 = vld [vmem:[%s2452_s19 + $0x1a0] sm:$0xf] }
  0x2f   : > { %v1814_v20 = vor.u32 %v2108_v13, %v1813_v12 }
  0x31   : > { %910 = vmatpush.bf16.msra.mxu0 %v2161_v14  ;;  %2185 = vmatpush.bf16.msra.mxu2 %v2161_v14  ;;  %v1941_v14 = vld [vmem:[%s2452_s19 + $0x150] sm:$0xf] }
  0x32   : > { %1079 = vmatpush.bf16.msra.mxu1 %v2169_v15  ;;  %2193 = vmatpush.bf16.msra.mxu3 %v2169_v15  ;;  %v2140_v15 = vld [vmem:[%s2452_s19 + $0x154] sm:$0xf0] }
  0x33   : > { %v1942_v21 = vor.u32 %v2140_v15, %v1941_v14  ;;  %v2148_v14 = vld [vmem:[%s2452_s19 + $0x194] sm:$0xf0]  ;;  %v2115_v15 = vld [vmem:[%s2452_s19 + $0x94] sm:$0xf] }
  0x34   : > { %911 = vmatmul.bf16.vlgmr.msra.gmra.mxu0 %v1774_v24  ;;  %991 = vmatmul.bf16.vlgmr.msra.gmra.mxu2 %v1902_v25  ;;  %v1821_v24 = vld [vmem:[%s2452_s19 + $0x60] sm:$0xf]  ;;  %v2110_v25 = vld [vmem:[%s2452_s19 + $0x64] sm:$0xf0] }
  0x35   : > { %1080 = vmatmul.bf16.vlgmr.msra.gmra.mxu1 %v1778_v26  ;;  %1160 = vmatmul.bf16.vlgmr.msra.gmra.mxu3 %v1906_v27  ;;  %v1949_v26 = vld [vmem:[%s2452_s19 + $0x160] sm:$0xf]  ;;  %v2142_v27 = vld [vmem:[%s2452_s19 + $0x164] sm:$0xf0]  ;;  %v1822_v32 = vor.u32 %v2110_v25, %v1821_v24 }
  0x36   : > { %v1950_v33 = vor.u32 %v2142_v27, %v1949_v26  ;;  %v1850_v26 = vor.u32 %v2115_v15, %v1847_v16  ;;  %v1978_v27 = vor.u32 %v2147_v17, %v1975_v18  ;;  %v2152_v15 = vld [vmem:[%s2452_s19 + $0x1b4] sm:$0xf0]  ;;  %v2119_v16 = vld [vmem:[%s2452_s19 + $0xb4] sm:$0xf]  ;;  %v1863_v17 = vld [vmem:[%s2452_s19 + $0xb8] sm:$0xf0] }
  0x37   : > { %v2151_v18 = vld [vmem:[%s2452_s19 + $0x1b4] sm:$0xf] }
  0x44   : > { %916 = vmatmul.bf16.gmra.mxu0 %v1782_v36  ;;  %996 = vmatmul.bf16.gmra.mxu2 %v1910_v37  ;;  %v1829_v36 = vld [vmem:[%s2452_s19 + $0x70] sm:$0xf]  ;;  %v2112_v37 = vld [vmem:[%s2452_s19 + $0x74] sm:$0xf0] }
  0x45   : > { %1085 = vmatmul.bf16.gmra.mxu1 %v1786_v38  ;;  %1165 = vmatmul.bf16.gmra.mxu3 %v1914_v39  ;;  %v1957_v38 = vld [vmem:[%s2452_s19 + $0x170] sm:$0xf]  ;;  %v2144_v39 = vld [vmem:[%s2452_s19 + $0x174] sm:$0xf0]  ;;  %v1830_v44 = vor.u32 %v2112_v37, %v1829_v36 }
  0x46   : > { %v1958_v45 = vor.u32 %v2144_v39, %v1957_v38 }
  0x54   : > { %921 = vmatmul.bf16.gmra.mxu0 %v1790_v48  ;;  %1001 = vmatmul.bf16.gmra.mxu2 %v1918_v49  ;;  %v1837_v48 = vld [vmem:[%s2452_s19 + $0x80] sm:$0xf]  ;;  %v2114_v49 = vld [vmem:[%s2452_s19 + $0x84] sm:$0xf0] }
  0x55   : > { %1090 = vmatmul.bf16.gmra.mxu1 %v1794_v50  ;;  %1170 = vmatmul.bf16.gmra.mxu3 %v1922_v51  ;;  %v1965_v50 = vld [vmem:[%s2452_s19 + $0x180] sm:$0xf]  ;;  %v2146_v51 = vld [vmem:[%s2452_s19 + $0x184] sm:$0xf0]  ;;  %v1838_v56 = vor.u32 %v2114_v49, %v1837_v48  ;;  %v1855_v48 = vld [vmem:[%s2452_s19 + $0xa8] sm:$0xf0] }
  0x56   : > { %v1966_v57 = vor.u32 %v2146_v51, %v1965_v50  ;;  %v2149_v49 = vld [vmem:[%s2452_s19 + $0x1a4] sm:$0xf]  ;;  %v1983_v50 = vld [vmem:[%s2452_s19 + $0x1a8] sm:$0xf0] }
  0x64   : > { %926 = vmatmul.bf16.gmra.mxu0 %v1798_v60  ;;  %1006 = vmatmul.bf16.gmra.mxu2 %v1926_v61  ;;  %v1842_v60 = vor.u32 %v2113_v52, %v1839_v53  ;;  %v1970_v61 = vor.u32 %v2145_v54, %v1967_v55  ;;  %v1854_v54 = vor.u32 %v2118_v42, %v1853_v41  ;;  %v1869_v42 = vld [vmem:[%s2452_s19 + $0xc0] sm:$0xf] }
  0x65   : > { %1095 = vmatmul.bf16.gmra.mxu1 %v1802_v62  ;;  %1175 = vmatmul.bf16.gmra.mxu3 %v1930_v63 }
  0x74   : > { %931 = vmatmul.bf16.gmra.mxu0 %v1806_v8  ;;  %1011 = vmatmul.bf16.gmra.mxu2 %v1934_v9  ;;  %v1845_v9 = vld [vmem:[%s2452_s19 + $0x90] sm:$0xf] }
  0x75   : > { %1100 = vmatmul.bf16.gmra.mxu1 %v1810_v10  ;;  %1180 = vmatmul.bf16.gmra.mxu3 %v1938_v11  ;;  %v2116_v10 = vld [vmem:[%s2452_s19 + $0x94] sm:$0xf0]  ;;  %v1973_v11 = vld [vmem:[%s2452_s19 + $0x190] sm:$0xf] }
  0x84   : > { %936 = vmatmul.bf16.gmra.mxu0 %v1814_v20  ;;  %1016 = vmatmul.bf16.gmra.mxu2 %v1942_v21 }
  0x85   : > { %1105 = vmatmul.bf16.gmra.mxu1 %v1818_v22  ;;  %1185 = vmatmul.bf16.gmra.mxu3 %v1946_v23  ;;  %v1846_v22 = vor.u32 %v2116_v10, %v1845_v9  ;;  %v1974_v23 = vor.u32 %v2148_v14, %v1973_v11  ;;  %v1861_v10 = vld [vmem:[%s2452_s19 + $0xb0] sm:$0xf]  ;;  %v2120_v11 = vld [vmem:[%s2452_s19 + $0xb4] sm:$0xf0] }
  0x94   : > { %941 = vmatmul.bf16.gmra.mxu0 %v1822_v32  ;;  %1021 = vmatmul.bf16.gmra.mxu2 %v1950_v33 }
  0x95   : > { %1110 = vmatmul.bf16.gmra.mxu1 %v1826_v34  ;;  %1190 = vmatmul.bf16.gmra.mxu3 %v1954_v35 }
  0xa4   : > { %946 = vmatmul.bf16.gmra.mxu0 %v1830_v44  ;;  %1026 = vmatmul.bf16.gmra.mxu2 %v1958_v45 }
  0xa5   : > { %1115 = vmatmul.bf16.gmra.mxu1 %v1834_v46  ;;  %1195 = vmatmul.bf16.gmra.mxu3 %v1962_v47  ;;  %v2150_v46 = vld [vmem:[%s2452_s19 + $0x1a4] sm:$0xf0]  ;;  %v2117_v47 = vld [vmem:[%s2452_s19 + $0xa4] sm:$0xf] }
  0xa6   : > { %v1982_v55 = vor.u32 %v2150_v46, %v1981_v43  ;;  %v2122_v43 = vld [vmem:[%s2452_s19 + $0xc4] sm:$0xf0] }
  0xb1   : > { %v912_v58 = vpop.f32.mrf.mxu0 }
  0xb2   : > { %v1081_v62 = vpop.f32.mrf.mxu1 }
  0xb3   : > { %v1082_v63 = vadd.f32 %v1081_v62, %v912_v58  ;;  %v1858_v58 = vor.u32 %v2117_v47, %v1855_v48  ;;  %v2154_v47 = vld [vmem:[%s2452_s19 + $0x1c4] sm:$0xf0]  ;;  %v2121_v48 = vld [vmem:[%s2452_s19 + $0xc4] sm:$0xf] }
  0xb4   : > { %951 = vmatmul.bf16.gmra.mxu0 %v1838_v56  ;;  %1031 = vmatmul.bf16.gmra.mxu2 %v1966_v57 }
  0xb5   : > { %v1440_v0 = vadd.f32 %v2539_v59, %v1082_v63  ;;  %1120 = vmatmul.bf16.gmra.mxu1 %v1842_v60  ;;  %1200 = vmatmul.bf16.gmra.mxu3 %v1970_v61  ;;  %v1986_v60 = vor.u32 %v2149_v49, %v1983_v50  ;;  %v1871_v49 = vld [vmem:[%s2452_s19 + $0xc8] sm:$0xf0]  ;;  %v2153_v50 = vld [vmem:[%s2452_s19 + $0x1c4] sm:$0xf] }
  0xb7   : > { %v1504_v1 = vmax.f32 %v1440_v0, 0.0  ;;  %v992_v2 = vpop.f32.mrf.mxu2 }
  0xb8   : > { %v1161_v3 = vpop.f32.mrf.mxu3 }
  0xb9   : > { %1568 = vst [vmem:[%s2544_s6] sm:$0xff] %v1504_v1  ;;  %v1162_v4 = vadd.f32 %v1161_v3, %v992_v2  ;;  %v914_v5 = vpop.f32.mrf.mxu0 }
  0xba   : > { %v1083_v6 = vpop.f32.mrf.mxu1 }
  0xbb   : > { %v1472_v7 = vadd.f32 %v2539_v59, %v1162_v4  ;;  %v1084_v8 = vadd.f32 %v1083_v6, %v914_v5 }
  0xbd   : > { %v1536_v12 = vmax.f32 %v1472_v7, 0.0  ;;  %v1441_v13 = vadd.f32 %v2539_v59, %v1084_v8 }
  0xbf   : > { %1600 = vst [vmem:[%s2544_s6 + $0x100] sm:$0xff] %v1536_v12  ;;  %v1505_v19 = vmax.f32 %v1441_v13, 0.0  ;;  %v994_v20 = vpop.f32.mrf.mxu2  ;;  %v1989_v12 = vld [vmem:[%s2452_s19 + $0x1b0] sm:$0xf] }
  0xc0   : > { %v1163_v21 = vpop.f32.mrf.mxu3 }
  0xc1   : > { %1569 = vst [vmem:[%s2544_s6 + $0x8] sm:$0xff] %v1505_v19  ;;  %v1164_v24 = vadd.f32 %v1163_v21, %v994_v20  ;;  %v917_v25 = vpop.f32.mrf.mxu0  ;;  %v1991_v19 = vld [vmem:[%s2452_s19 + $0x1b8] sm:$0xf0] }
  0xc2   : > { %v1086_v28 = vpop.f32.mrf.mxu1 }
  0xc3   : > { %v1473_v29 = vadd.f32 %v2539_v59, %v1164_v24  ;;  %v1087_v30 = vadd.f32 %v1086_v28, %v917_v25  ;;  %v1990_v24 = vor.u32 %v2152_v15, %v1989_v12  ;;  %v1994_v28 = vor.u32 %v2151_v18, %v1991_v19  ;;  %v2124_v12 = vld [vmem:[%s2452_s19 + $0xd4] sm:$0xf0]  ;;  %v1879_v18 = vld [vmem:[%s2452_s19 + $0xd8] sm:$0xf0]  ;;  %v2155_v19 = vld [vmem:[%s2452_s19 + $0x1d4] sm:$0xf] }
  0xc4   : > { %956 = vmatmul.bf16.gmra.mxu0 %v1846_v22  ;;  %1036 = vmatmul.bf16.gmra.mxu2 %v1974_v23  ;;  %v1862_v23 = vor.u32 %v2120_v11, %v1861_v10  ;;  %v1877_v11 = vld [vmem:[%s2452_s19 + $0xd0] sm:$0xf] }
  0xc5   : > { %v1537_v31 = vmax.f32 %v1473_v29, 0.0  ;;  %v1442_v32 = vadd.f32 %v2539_v59, %v1087_v30  ;;  %1125 = vmatmul.bf16.gmra.mxu1 %v1850_v26  ;;  %1205 = vmatmul.bf16.gmra.mxu3 %v1978_v27  ;;  %v1866_v27 = vor.u32 %v2119_v16, %v1863_v17  ;;  %v2156_v16 = vld [vmem:[%s2452_s19 + $0x1d4] sm:$0xf0]  ;;  %v2123_v17 = vld [vmem:[%s2452_s19 + $0xd4] sm:$0xf] }
  0xc7   : > { %1601 = vst [vmem:[%s2544_s6 + $0x108] sm:$0xff] %v1537_v31  ;;  %v1506_v33 = vmax.f32 %v1442_v32, 0.0  ;;  %v997_v34 = vpop.f32.mrf.mxu2 }
  0xc8   : > { %v1166_v35 = vpop.f32.mrf.mxu3 }
  0xc9   : > { %1570 = vst [vmem:[%s2544_s6 + $0x10] sm:$0xff] %v1506_v33  ;;  %v1167_v36 = vadd.f32 %v1166_v35, %v997_v34  ;;  %v919_v37 = vpop.f32.mrf.mxu0 }
  0xca   : > { %v1088_v38 = vpop.f32.mrf.mxu1 }
  0xcb   : > { %v1474_v39 = vadd.f32 %v2539_v59, %v1167_v36  ;;  %v1089_v40 = vadd.f32 %v1088_v38, %v919_v37 }
  0xcd   : > { %v1538_v44 = vmax.f32 %v1474_v39, 0.0  ;;  %v1443_v45 = vadd.f32 %v2539_v59, %v1089_v40 }
  0xcf   : > { %1602 = vst [vmem:[%s2544_s6 + $0x110] sm:$0xff] %v1538_v44  ;;  %v1507_v51 = vmax.f32 %v1443_v45, 0.0  ;;  %v999_v52 = vpop.f32.mrf.mxu2  ;;  %v1997_v44 = vld [vmem:[%s2452_s19 + $0x1c0] sm:$0xf] }
  0xd0   : > { %v1168_v53 = vpop.f32.mrf.mxu3 }
  0xd1   : > { %1571 = vst [vmem:[%s2544_s6 + $0x18] sm:$0xff] %v1507_v51  ;;  %v1169_v56 = vadd.f32 %v1168_v53, %v999_v52  ;;  %v922_v57 = vpop.f32.mrf.mxu0  ;;  %v1999_v51 = vld [vmem:[%s2452_s19 + $0x1c8] sm:$0xf0] }
  0xd2   : > { %v1091_v61 = vpop.f32.mrf.mxu1 }
  0xd3   : > { %v1475_v62 = vadd.f32 %v2539_v59, %v1169_v56  ;;  %v1092_v63 = vadd.f32 %v1091_v61, %v922_v57  ;;  %v1998_v56 = vor.u32 %v2154_v47, %v1997_v44  ;;  %v2002_v61 = vor.u32 %v2153_v50, %v1999_v51  ;;  %v2126_v44 = vld [vmem:[%s2452_s19 + $0xe4] sm:$0xf0]  ;;  %v1887_v50 = vld [vmem:[%s2452_s19 + $0xe8] sm:$0xf0]  ;;  %v2157_v51 = vld [vmem:[%s2452_s19 + $0x1e4] sm:$0xf] }
  0xd4   : > { %961 = vmatmul.bf16.gmra.mxu0 %v1854_v54  ;;  %1041 = vmatmul.bf16.gmra.mxu2 %v1982_v55  ;;  %v1870_v55 = vor.u32 %v2122_v43, %v1869_v42  ;;  %v1885_v43 = vld [vmem:[%s2452_s19 + $0xe0] sm:$0xf] }
  0xd5   : > { %v1539_v0 = vmax.f32 %v1475_v62, 0.0  ;;  %v1444_v1 = vadd.f32 %v2539_v59, %v1092_v63  ;;  %1130 = vmatmul.bf16.gmra.mxu1 %v1858_v58  ;;  %1210 = vmatmul.bf16.gmra.mxu3 %v1986_v60  ;;  %v1874_v60 = vor.u32 %v2121_v48, %v1871_v49  ;;  %v2158_v48 = vld [vmem:[%s2452_s19 + $0x1e4] sm:$0xf0]  ;;  %v2125_v49 = vld [vmem:[%s2452_s19 + $0xe4] sm:$0xf] }
  0xd7   : > { %1603 = vst [vmem:[%s2544_s6 + $0x118] sm:$0xff] %v1539_v0  ;;  %v1508_v2 = vmax.f32 %v1444_v1, 0.0  ;;  %v1002_v3 = vpop.f32.mrf.mxu2 }
  0xd8   : > { %v1171_v4 = vpop.f32.mrf.mxu3 }
  0xd9   : > { %1572 = vst [vmem:[%s2544_s6 + $0x20] sm:$0xff] %v1508_v2  ;;  %v1172_v5 = vadd.f32 %v1171_v4, %v1002_v3  ;;  %v924_v6 = vpop.f32.mrf.mxu0 }
  0xda   : > { %v1093_v7 = vpop.f32.mrf.mxu1 }
  0xdb   : > { %v1476_v8 = vadd.f32 %v2539_v59, %v1172_v5  ;;  %v1094_v9 = vadd.f32 %v1093_v7, %v924_v6 }
  0xdd   : > { %v1540_v13 = vmax.f32 %v1476_v8, 0.0  ;;  %v1445_v14 = vadd.f32 %v2539_v59, %v1094_v9 }
  0xdf   : > { %1604 = vst [vmem:[%s2544_s6 + $0x120] sm:$0xff] %v1540_v13  ;;  %v1509_v20 = vmax.f32 %v1445_v14, 0.0  ;;  %v1004_v21 = vpop.f32.mrf.mxu2  ;;  %v2005_v13 = vld [vmem:[%s2452_s19 + $0x1d0] sm:$0xf] }
  0xe0   : > { %v1173_v22 = vpop.f32.mrf.mxu3 }
  0xe1   : > { %1573 = vst [vmem:[%s2544_s6 + $0x28] sm:$0xff] %v1509_v20  ;;  %v1174_v25 = vadd.f32 %v1173_v22, %v1004_v21  ;;  %v927_v26 = vpop.f32.mrf.mxu0  ;;  %v2007_v20 = vld [vmem:[%s2452_s19 + $0x1d8] sm:$0xf0] }
  0xe2   : > { %v1096_v29 = vpop.f32.mrf.mxu1 }
  0xe3   : > { %v1477_v30 = vadd.f32 %v2539_v59, %v1174_v25  ;;  %v1097_v31 = vadd.f32 %v1096_v29, %v927_v26  ;;  %v2006_v25 = vor.u32 %v2156_v16, %v2005_v13  ;;  %v2010_v29 = vor.u32 %v2155_v19, %v2007_v20  ;;  %v2128_v13 = vld [vmem:[%s2452_s19 + $0xf4] sm:$0xf0]  ;;  %v1895_v19 = vld [vmem:[%s2452_s19 + $0xf8] sm:$0xf0]  ;;  %v2159_v20 = vld [vmem:[%s2452_s19 + $0x1f4] sm:$0xf] }
  0xe4   : > { %966 = vmatmul.bf16.gmra.mxu0 %v1862_v23  ;;  %1046 = vmatmul.bf16.gmra.mxu2 %v1990_v24  ;;  %v1878_v24 = vor.u32 %v2124_v12, %v1877_v11  ;;  %v1893_v12 = vld [vmem:[%s2452_s19 + $0xf0] sm:$0xf] }
  0xe5   : > { %v1541_v32 = vmax.f32 %v1477_v30, 0.0  ;;  %v1446_v33 = vadd.f32 %v2539_v59, %v1097_v31  ;;  %1135 = vmatmul.bf16.gmra.mxu1 %v1866_v27  ;;  %1215 = vmatmul.bf16.gmra.mxu3 %v1994_v28  ;;  %v1882_v28 = vor.u32 %v2123_v17, %v1879_v18  ;;  %v2160_v17 = vld [vmem:[%s2452_s19 + $0x1f4] sm:$0xf0]  ;;  %v2127_v18 = vld [vmem:[%s2452_s19 + $0xf4] sm:$0xf] }
  0xe7   : > { %1605 = vst [vmem:[%s2544_s6 + $0x128] sm:$0xff] %v1541_v32  ;;  %v1510_v34 = vmax.f32 %v1446_v33, 0.0  ;;  %v1007_v35 = vpop.f32.mrf.mxu2 }
  0xe8   : > { %v1176_v36 = vpop.f32.mrf.mxu3 }
  0xe9   : > { %1574 = vst [vmem:[%s2544_s6 + $0x30] sm:$0xff] %v1510_v34  ;;  %v1177_v37 = vadd.f32 %v1176_v36, %v1007_v35  ;;  %v929_v38 = vpop.f32.mrf.mxu0 }
  0xea   : > { %v1098_v39 = vpop.f32.mrf.mxu1 }
  0xeb   : > { %v1478_v40 = vadd.f32 %v2539_v59, %v1177_v37  ;;  %v1099_v41 = vadd.f32 %v1098_v39, %v929_v38 }
  0xed   : > { %v1542_v45 = vmax.f32 %v1478_v40, 0.0  ;;  %v1447_v46 = vadd.f32 %v2539_v59, %v1099_v41 }
  0xef   : > { %1606 = vst [vmem:[%s2544_s6 + $0x130] sm:$0xff] %v1542_v45  ;;  %v1511_v52 = vmax.f32 %v1447_v46, 0.0  ;;  %v1009_v53 = vpop.f32.mrf.mxu2  ;;  %v2013_v45 = vld [vmem:[%s2452_s19 + $0x1e0] sm:$0xf] }
  0xf0   : > { %v1178_v54 = vpop.f32.mrf.mxu3 }
  0xf1   : > { %1575 = vst [vmem:[%s2544_s6 + $0x38] sm:$0xff] %v1511_v52  ;;  %v1179_v57 = vadd.f32 %v1178_v54, %v1009_v53  ;;  %v932_v58 = vpop.f32.mrf.mxu0  ;;  %v2015_v52 = vld [vmem:[%s2452_s19 + $0x1e8] sm:$0xf0] }
  0xf2   : > { %v1101_v62 = vpop.f32.mrf.mxu1 }
  0xf3   : > { %v1479_v63 = vadd.f32 %v2539_v59, %v1179_v57  ;;  %v1102_v0 = vadd.f32 %v1101_v62, %v932_v58  ;;  %v2014_v57 = vor.u32 %v2158_v48, %v2013_v45  ;;  %v2018_v62 = vor.u32 %v2157_v51, %v2015_v52 }
  0xf4   : > { %971 = vmatmul.bf16.gmra.mxu0 %v1870_v55  ;;  %1051 = vmatmul.bf16.gmra.mxu2 %v1998_v56  ;;  %v1886_v56 = vor.u32 %v2126_v44, %v1885_v43 }
  0xf5   : > { %v1543_v1 = vmax.f32 %v1479_v63, 0.0  ;;  %v1448_v2 = vadd.f32 %v2539_v59, %v1102_v0  ;;  %1140 = vmatmul.bf16.gmra.mxu1 %v1874_v60  ;;  %1220 = vmatmul.bf16.gmra.mxu3 %v2002_v61  ;;  %v1890_v61 = vor.u32 %v2125_v49, %v1887_v50 }
  0xf7   : > { %1607 = vst [vmem:[%s2544_s6 + $0x138] sm:$0xff] %v1543_v1  ;;  %v1512_v3 = vmax.f32 %v1448_v2, 0.0  ;;  %v1012_v4 = vpop.f32.mrf.mxu2 }
  0xf8   : > { %v1181_v5 = vpop.f32.mrf.mxu3 }
  0xf9   : > { %1576 = vst [vmem:[%s2544_s6 + $0x40] sm:$0xff] %v1512_v3  ;;  %v1182_v6 = vadd.f32 %v1181_v5, %v1012_v4  ;;  %v934_v7 = vpop.f32.mrf.mxu0 }
  0xfa   : > { %v1103_v8 = vpop.f32.mrf.mxu1 }
  0xfb   : > { %v1480_v9 = vadd.f32 %v2539_v59, %v1182_v6  ;;  %v1104_v10 = vadd.f32 %v1103_v8, %v934_v7 }
  0xfd   : > { %v1544_v14 = vmax.f32 %v1480_v9, 0.0  ;;  %v1449_v15 = vadd.f32 %v2539_v59, %v1104_v10 }
  0xff   : > { %1608 = vst [vmem:[%s2544_s6 + $0x140] sm:$0xff] %v1544_v14  ;;  %v1513_v21 = vmax.f32 %v1449_v15, 0.0  ;;  %v1014_v22 = vpop.f32.mrf.mxu2  ;;  %v2021_v14 = vld [vmem:[%s2452_s19 + $0x1f0] sm:$0xf] }
 0x100   : > { %v1183_v23 = vpop.f32.mrf.mxu3 }
 0x101   : > { %1577 = vst [vmem:[%s2544_s6 + $0x48] sm:$0xff] %v1513_v21  ;;  %v1184_v26 = vadd.f32 %v1183_v23, %v1014_v22  ;;  %v937_v27 = vpop.f32.mrf.mxu0  ;;  %v2023_v21 = vld [vmem:[%s2452_s19 + $0x1f8] sm:$0xf0]  ;;  %s1648_s19 = sshll.u32 %s1645_s10, 4  ;;  %s1649_s19 = int_to_ptr.hbm [resolvable:$true] %s1648_s19 }
 0x102   : > { %v1106_v30 = vpop.f32.mrf.mxu1  ;;  %s2266_s11 = sshra.s32 %s1649_s19, 4  ;;  %s2267_s11 = int_to_ptr.hbm [resolvable:$true] %s2266_s11 }
 0x103   : > { %v1481_v31 = vadd.f32 %v2539_v59, %v1184_v26  ;;  %v1107_v32 = vadd.f32 %v1106_v30, %v937_v27  ;;  %v2022_v26 = vor.u32 %v2160_v17, %v2021_v14  ;;  %v2026_v30 = vor.u32 %v2159_v20, %v2023_v21  ;;  %s2268_s21 = scalar_lea.hbm %s2267_s11, 512  ;;  %p2273_p1 = scmp.lt.s32.totalorder %s2267_s11, %s2771_s3 }
 0x104   : > { %976 = vmatmul.bf16.gmra.mxu0 %v1878_v24  ;;  %1056 = vmatmul.bf16.gmra.mxu2 %v2006_v25  ;;  %v1894_v25 = vor.u32 %v2128_v13, %v1893_v12  ;;  %p2269_p12 = scmp.ne.s32.totalorder %s2267_s11, %s2268_s21  ;;  %p2274_p2 = scmp.lt.s32.totalorder %s2272_s27, %s2268_s21 }
 0x105   : > { %v1545_v33 = vmax.f32 %v1481_v31, 0.0  ;;  %v1450_v34 = vadd.f32 %v2539_v59, %v1107_v32  ;;  %1145 = vmatmul.bf16.gmra.mxu1 %v1882_v28  ;;  %1225 = vmatmul.bf16.gmra.mxu3 %v2010_v29  ;;  %v1898_v29 = vor.u32 %v2127_v18, %v1895_v19 }
 0x106   : > { %p2270_p13 = pnand %p2269_p12, %p2394_p4  ;;  %p2275_p3 = por %p2274_p2, %p2273_p1 }
 0x107   : > { %1609 = vst [vmem:[%s2544_s6 + $0x148] sm:$0xff] %v1545_v33  ;;  %v1514_v35 = vmax.f32 %v1450_v34, 0.0  ;;  %v1017_v36 = vpop.f32.mrf.mxu2 }
 0x108   : > { %v1186_v37 = vpop.f32.mrf.mxu3  ;;  %p2271_p0 = pneg %p2270_p13 }
 0x109   : > { %1578 = vst [vmem:[%s2544_s6 + $0x50] sm:$0xff] %v1514_v35  ;;  %v1187_v38 = vadd.f32 %v1186_v37, %v1017_v36  ;;  %v939_v39 = vpop.f32.mrf.mxu0 }
 0x10a   : > { %v1108_v40 = vpop.f32.mrf.mxu1  ;;  %p2276_p5 = pnand %p2275_p3, %p2271_p0 }
 0x10b   : > { %v1482_v41 = vadd.f32 %v2539_v59, %v1187_v38  ;;  %v1109_v42 = vadd.f32 %v1108_v40, %v939_v39 }
 0x10d   : > { %v1546_v46 = vmax.f32 %v1482_v41, 0.0  ;;  %v1451_v47 = vadd.f32 %v2539_v59, %v1109_v42 }
 0x10f   : > { %1610 = vst [vmem:[%s2544_s6 + $0x150] sm:$0xff] %v1546_v46  ;;  %v1515_v53 = vmax.f32 %v1451_v47, 0.0  ;;  %v1019_v54 = vpop.f32.mrf.mxu2 }
 0x110   : > { %v1188_v55 = vpop.f32.mrf.mxu3 }
 0x111   : > { %1579 = vst [vmem:[%s2544_s6 + $0x58] sm:$0xff] %v1515_v53  ;;  %v1189_v58 = vadd.f32 %v1188_v55, %v1019_v54  ;;  %v942_v60 = vpop.f32.mrf.mxu0 }
 0x112   : > { %v1111_v63 = vpop.f32.mrf.mxu1 }
 0x113   : > { %v1483_v0 = vadd.f32 %v2539_v59, %v1189_v58  ;;  %v1112_v1 = vadd.f32 %v1111_v63, %v942_v60 }
 0x114   : > { %981 = vmatmul.bf16.gmra.mxu0 %v1886_v56  ;;  %1061 = vmatmul.bf16.gmra.mxu2 %v2014_v57 }
 0x115   : > { %v1547_v2 = vmax.f32 %v1483_v0, 0.0  ;;  %v1452_v3 = vadd.f32 %v2539_v59, %v1112_v1  ;;  %1150 = vmatmul.bf16.gmra.mxu1 %v1890_v61  ;;  %1230 = vmatmul.bf16.gmra.mxu3 %v2018_v62 }
 0x117   : > { %1611 = vst [vmem:[%s2544_s6 + $0x158] sm:$0xff] %v1547_v2  ;;  %v1516_v4 = vmax.f32 %v1452_v3, 0.0  ;;  %v1022_v5 = vpop.f32.mrf.mxu2 }
 0x118   : > { %v1191_v6 = vpop.f32.mrf.mxu3 }
 0x119   : > { %1580 = vst [vmem:[%s2544_s6 + $0x60] sm:$0xff] %v1516_v4  ;;  %v1192_v7 = vadd.f32 %v1191_v6, %v1022_v5  ;;  %v944_v8 = vpop.f32.mrf.mxu0 }
 0x11a   : > { %v1113_v9 = vpop.f32.mrf.mxu1 }
 0x11b   : > { %v1484_v10 = vadd.f32 %v2539_v59, %v1192_v7  ;;  %v1114_v11 = vadd.f32 %v1113_v9, %v944_v8 }
 0x11d   : > { %v1548_v15 = vmax.f32 %v1484_v10, 0.0  ;;  %v1453_v16 = vadd.f32 %v2539_v59, %v1114_v11 }
 0x11f   : > { %1612 = vst [vmem:[%s2544_s6 + $0x160] sm:$0xff] %v1548_v15  ;;  %v1517_v22 = vmax.f32 %v1453_v16, 0.0  ;;  %v1024_v23 = vpop.f32.mrf.mxu2 }
 0x120   : > { %v1193_v24 = vpop.f32.mrf.mxu3 }
 0x121   : > { %1581 = vst [vmem:[%s2544_s6 + $0x68] sm:$0xff] %v1517_v22  ;;  %v1194_v27 = vadd.f32 %v1193_v24, %v1024_v23  ;;  %v947_v28 = vpop.f32.mrf.mxu0 }
 0x122   : > { %v1116_v31 = vpop.f32.mrf.mxu1 }
 0x123   : > { %v1485_v32 = vadd.f32 %v2539_v59, %v1194_v27  ;;  %v1117_v33 = vadd.f32 %v1116_v31, %v947_v28 }
 0x124   : > { %986 = vmatmul.bf16.gmra.mxu0 %v1894_v25  ;;  %1066 = vmatmul.bf16.gmra.mxu2 %v2022_v26 }
 0x125   : > { %v1549_v34 = vmax.f32 %v1485_v32, 0.0  ;;  %v1454_v35 = vadd.f32 %v2539_v59, %v1117_v33  ;;  %1155 = vmatmul.bf16.gmra.mxu1 %v1898_v29  ;;  %1235 = vmatmul.bf16.gmra.mxu3 %v2026_v30 }
 0x127   : > { %1613 = vst [vmem:[%s2544_s6 + $0x168] sm:$0xff] %v1549_v34  ;;  %v1518_v36 = vmax.f32 %v1454_v35, 0.0  ;;  %v1027_v37 = vpop.f32.mrf.mxu2 }
 0x128   : > { %v1196_v38 = vpop.f32.mrf.mxu3 }
 0x129   : > { %1582 = vst [vmem:[%s2544_s6 + $0x70] sm:$0xff] %v1518_v36  ;;  %v1197_v39 = vadd.f32 %v1196_v38, %v1027_v37  ;;  %v949_v40 = vpop.f32.mrf.mxu0 }
 0x12a   : > { %v1118_v41 = vpop.f32.mrf.mxu1 }
 0x12b   : > { %v1486_v42 = vadd.f32 %v2539_v59, %v1197_v39  ;;  %v1119_v43 = vadd.f32 %v1118_v41, %v949_v40 }
 0x12d   : > { %v1550_v44 = vmax.f32 %v1486_v42, 0.0  ;;  %v1455_v45 = vadd.f32 %v2539_v59, %v1119_v43 }
 0x12f   : > { %1614 = vst [vmem:[%s2544_s6 + $0x170] sm:$0xff] %v1550_v44  ;;  %v1519_v46 = vmax.f32 %v1455_v45, 0.0  ;;  %v1029_v47 = vpop.f32.mrf.mxu2 }
 0x130   : > { %v1198_v48 = vpop.f32.mrf.mxu3 }
 0x131   : > { %1583 = vst [vmem:[%s2544_s6 + $0x78] sm:$0xff] %v1519_v46  ;;  %v1199_v49 = vadd.f32 %v1198_v48, %v1029_v47  ;;  %v952_v50 = vpop.f32.mrf.mxu0 }
 0x132   : > { %v1121_v51 = vpop.f32.mrf.mxu1 }
 0x133   : > { %v1487_v52 = vadd.f32 %v2539_v59, %v1199_v49  ;;  %v1122_v53 = vadd.f32 %v1121_v51, %v952_v50 }
 0x135   : > { %v1551_v54 = vmax.f32 %v1487_v52, 0.0  ;;  %v1456_v55 = vadd.f32 %v2539_v59, %v1122_v53 }
 0x137   : > { %1615 = vst [vmem:[%s2544_s6 + $0x178] sm:$0xff] %v1551_v54  ;;  %v1520_v56 = vmax.f32 %v1456_v55, 0.0  ;;  %v1032_v57 = vpop.f32.mrf.mxu2 }
 0x138   : > { %v1201_v58 = vpop.f32.mrf.mxu3 }
 0x139   : > { %1584 = vst [vmem:[%s2544_s6 + $0x80] sm:$0xff] %v1520_v56  ;;  %v1202_v60 = vadd.f32 %v1201_v58, %v1032_v57  ;;  %v954_v61 = vpop.f32.mrf.mxu0 }
 0x13a   : > { %v1123_v62 = vpop.f32.mrf.mxu1 }
 0x13b   : > { %v1488_v63 = vadd.f32 %v2539_v59, %v1202_v60  ;;  %v1124_v0 = vadd.f32 %v1123_v62, %v954_v61 }
 0x13d   : > { %v1552_v1 = vmax.f32 %v1488_v63, 0.0  ;;  %v1457_v2 = vadd.f32 %v2539_v59, %v1124_v0 }
 0x13f   : > { %1616 = vst [vmem:[%s2544_s6 + $0x180] sm:$0xff] %v1552_v1  ;;  %v1521_v3 = vmax.f32 %v1457_v2, 0.0  ;;  %v1034_v4 = vpop.f32.mrf.mxu2 }
 0x140   : > { %v1203_v5 = vpop.f32.mrf.mxu3 }
 0x141   : > { %1585 = vst [vmem:[%s2544_s6 + $0x88] sm:$0xff] %v1521_v3  ;;  %v1204_v6 = vadd.f32 %v1203_v5, %v1034_v4  ;;  %v957_v7 = vpop.f32.mrf.mxu0 }
 0x142   : > { %v1126_v8 = vpop.f32.mrf.mxu1 }
 0x143   : > { %v1489_v9 = vadd.f32 %v2539_v59, %v1204_v6  ;;  %v1127_v10 = vadd.f32 %v1126_v8, %v957_v7 }
 0x145   : > { %v1553_v11 = vmax.f32 %v1489_v9, 0.0  ;;  %v1458_v12 = vadd.f32 %v2539_v59, %v1127_v10 }
 0x147   : > { %1617 = vst [vmem:[%s2544_s6 + $0x188] sm:$0xff] %v1553_v11  ;;  %v1522_v13 = vmax.f32 %v1458_v12, 0.0  ;;  %v1037_v14 = vpop.f32.mrf.mxu2 }
 0x148   : > { %v1206_v15 = vpop.f32.mrf.mxu3 }
 0x149   : > { %1586 = vst [vmem:[%s2544_s6 + $0x90] sm:$0xff] %v1522_v13  ;;  %v1207_v16 = vadd.f32 %v1206_v15, %v1037_v14  ;;  %v959_v17 = vpop.f32.mrf.mxu0 }
 0x14a   : > { %v1128_v18 = vpop.f32.mrf.mxu1 }
 0x14b   : > { %v1490_v19 = vadd.f32 %v2539_v59, %v1207_v16  ;;  %v1129_v20 = vadd.f32 %v1128_v18, %v959_v17 }
 0x14d   : > { %v1554_v21 = vmax.f32 %v1490_v19, 0.0  ;;  %v1459_v22 = vadd.f32 %v2539_v59, %v1129_v20 }
 0x14f   : > { %1618 = vst [vmem:[%s2544_s6 + $0x190] sm:$0xff] %v1554_v21  ;;  %v1523_v23 = vmax.f32 %v1459_v22, 0.0  ;;  %v1039_v24 = vpop.f32.mrf.mxu2 }
 0x150   : > { %v1208_v25 = vpop.f32.mrf.mxu3 }
 0x151   : > { %1587 = vst [vmem:[%s2544_s6 + $0x98] sm:$0xff] %v1523_v23  ;;  %v1209_v26 = vadd.f32 %v1208_v25, %v1039_v24  ;;  %v962_v27 = vpop.f32.mrf.mxu0 }
 0x152   : > { %v1131_v28 = vpop.f32.mrf.mxu1 }
 0x153   : > { %v1491_v29 = vadd.f32 %v2539_v59, %v1209_v26  ;;  %v1132_v30 = vadd.f32 %v1131_v28, %v962_v27 }
 0x155   : > { %v1555_v31 = vmax.f32 %v1491_v29, 0.0  ;;  %v1460_v32 = vadd.f32 %v2539_v59, %v1132_v30 }
 0x157   : > { %1619 = vst [vmem:[%s2544_s6 + $0x198] sm:$0xff] %v1555_v31  ;;  %v1524_v33 = vmax.f32 %v1460_v32, 0.0  ;;  %v1042_v34 = vpop.f32.mrf.mxu2 }
 0x158   : > { %v1211_v35 = vpop.f32.mrf.mxu3 }
 0x159   : > { %1588 = vst [vmem:[%s2544_s6 + $0xa0] sm:$0xff] %v1524_v33  ;;  %v1212_v36 = vadd.f32 %v1211_v35, %v1042_v34  ;;  %v964_v37 = vpop.f32.mrf.mxu0 }
 0x15a   : > { %v1133_v38 = vpop.f32.mrf.mxu1 }
 0x15b   : > { %v1492_v39 = vadd.f32 %v2539_v59, %v1212_v36  ;;  %v1134_v40 = vadd.f32 %v1133_v38, %v964_v37 }
 0x15d   : > { %v1556_v41 = vmax.f32 %v1492_v39, 0.0  ;;  %v1461_v42 = vadd.f32 %v2539_v59, %v1134_v40 }
 0x15f   : > { %1620 = vst [vmem:[%s2544_s6 + $0x1a0] sm:$0xff] %v1556_v41  ;;  %v1525_v43 = vmax.f32 %v1461_v42, 0.0  ;;  %v1044_v44 = vpop.f32.mrf.mxu2 }
 0x160   : > { %v1213_v45 = vpop.f32.mrf.mxu3 }
 0x161   : > { %1589 = vst [vmem:[%s2544_s6 + $0xa8] sm:$0xff] %v1525_v43  ;;  %v1214_v46 = vadd.f32 %v1213_v45, %v1044_v44  ;;  %v967_v47 = vpop.f32.mrf.mxu0 }
 0x162   : > { %v1136_v48 = vpop.f32.mrf.mxu1 }
 0x163   : > { %v1493_v49 = vadd.f32 %v2539_v59, %v1214_v46  ;;  %v1137_v50 = vadd.f32 %v1136_v48, %v967_v47 }
 0x165   : > { %v1557_v51 = vmax.f32 %v1493_v49, 0.0  ;;  %v1462_v52 = vadd.f32 %v2539_v59, %v1137_v50 }
 0x167   : > { %1621 = vst [vmem:[%s2544_s6 + $0x1a8] sm:$0xff] %v1557_v51  ;;  %v1526_v53 = vmax.f32 %v1462_v52, 0.0  ;;  %v1047_v54 = vpop.f32.mrf.mxu2 }
 0x168   : > { %v1216_v55 = vpop.f32.mrf.mxu3 }
 0x169   : > { %1590 = vst [vmem:[%s2544_s6 + $0xb0] sm:$0xff] %v1526_v53  ;;  %v1217_v56 = vadd.f32 %v1216_v55, %v1047_v54  ;;  %v969_v57 = vpop.f32.mrf.mxu0 }
 0x16a   : > { %v1138_v58 = vpop.f32.mrf.mxu1 }
 0x16b   : > { %v1494_v60 = vadd.f32 %v2539_v59, %v1217_v56  ;;  %v1139_v61 = vadd.f32 %v1138_v58, %v969_v57 }
 0x16d   : > { %v1558_v62 = vmax.f32 %v1494_v60, 0.0  ;;  %v1463_v63 = vadd.f32 %v2539_v59, %v1139_v61 }
 0x16f   : > { %1622 = vst [vmem:[%s2544_s6 + $0x1b0] sm:$0xff] %v1558_v62  ;;  %v1527_v0 = vmax.f32 %v1463_v63, 0.0  ;;  %v1049_v1 = vpop.f32.mrf.mxu2 }
 0x170   : > { %v1218_v2 = vpop.f32.mrf.mxu3 }
 0x171   : > { %1591 = vst [vmem:[%s2544_s6 + $0xb8] sm:$0xff] %v1527_v0  ;;  %v1219_v3 = vadd.f32 %v1218_v2, %v1049_v1  ;;  %v972_v4 = vpop.f32.mrf.mxu0 }
 0x172   : > { %v1141_v5 = vpop.f32.mrf.mxu1 }
 0x173   : > { %v1495_v6 = vadd.f32 %v2539_v59, %v1219_v3  ;;  %v1142_v7 = vadd.f32 %v1141_v5, %v972_v4 }
 0x175   : > { %v1559_v8 = vmax.f32 %v1495_v6, 0.0  ;;  %v1464_v9 = vadd.f32 %v2539_v59, %v1142_v7 }
 0x177   : > { %1623 = vst [vmem:[%s2544_s6 + $0x1b8] sm:$0xff] %v1559_v8  ;;  %v1528_v10 = vmax.f32 %v1464_v9, 0.0  ;;  %v1052_v11 = vpop.f32.mrf.mxu2 }
 0x178   : > { %v1221_v12 = vpop.f32.mrf.mxu3 }
 0x179   : > { %1592 = vst [vmem:[%s2544_s6 + $0xc0] sm:$0xff] %v1528_v10  ;;  %v1222_v13 = vadd.f32 %v1221_v12, %v1052_v11  ;;  %v974_v14 = vpop.f32.mrf.mxu0 }
 0x17a   : > { %v1143_v15 = vpop.f32.mrf.mxu1 }
 0x17b   : > { %v1496_v16 = vadd.f32 %v2539_v59, %v1222_v13  ;;  %v1144_v17 = vadd.f32 %v1143_v15, %v974_v14 }
 0x17d   : > { %v1560_v18 = vmax.f32 %v1496_v16, 0.0  ;;  %v1465_v19 = vadd.f32 %v2539_v59, %v1144_v17 }
 0x17f   : > { %1624 = vst [vmem:[%s2544_s6 + $0x1c0] sm:$0xff] %v1560_v18  ;;  %v1529_v20 = vmax.f32 %v1465_v19, 0.0  ;;  %v1054_v21 = vpop.f32.mrf.mxu2 }
 0x180   : > { %v1223_v22 = vpop.f32.mrf.mxu3 }
 0x181   : > { %1593 = vst [vmem:[%s2544_s6 + $0xc8] sm:$0xff] %v1529_v20  ;;  %v1224_v23 = vadd.f32 %v1223_v22, %v1054_v21  ;;  %v977_v24 = vpop.f32.mrf.mxu0 }
 0x182   : > { %v1146_v25 = vpop.f32.mrf.mxu1 }
 0x183   : > { %v1497_v26 = vadd.f32 %v2539_v59, %v1224_v23  ;;  %v1147_v27 = vadd.f32 %v1146_v25, %v977_v24 }
 0x185   : > { %v1561_v28 = vmax.f32 %v1497_v26, 0.0  ;;  %v1466_v29 = vadd.f32 %v2539_v59, %v1147_v27 }
 0x187   : > { %1625 = vst [vmem:[%s2544_s6 + $0x1c8] sm:$0xff] %v1561_v28  ;;  %v1530_v30 = vmax.f32 %v1466_v29, 0.0  ;;  %v1057_v31 = vpop.f32.mrf.mxu2 }
 0x188   : > { %v1226_v32 = vpop.f32.mrf.mxu3 }
 0x189   : > { %1594 = vst [vmem:[%s2544_s6 + $0xd0] sm:$0xff] %v1530_v30  ;;  %v1227_v33 = vadd.f32 %v1226_v32, %v1057_v31  ;;  %v979_v34 = vpop.f32.mrf.mxu0 }
 0x18a   : > { %v1148_v35 = vpop.f32.mrf.mxu1 }
 0x18b   : > { %v1498_v36 = vadd.f32 %v2539_v59, %v1227_v33  ;;  %v1149_v37 = vadd.f32 %v1148_v35, %v979_v34 }
 0x18d   : > { %v1562_v38 = vmax.f32 %v1498_v36, 0.0  ;;  %v1467_v39 = vadd.f32 %v2539_v59, %v1149_v37 }
 0x18f   : > { %1626 = vst [vmem:[%s2544_s6 + $0x1d0] sm:$0xff] %v1562_v38  ;;  %v1531_v40 = vmax.f32 %v1467_v39, 0.0  ;;  %v1059_v41 = vpop.f32.mrf.mxu2 }
 0x190   : > { %v1228_v42 = vpop.f32.mrf.mxu3 }
 0x191   : > { %1595 = vst [vmem:[%s2544_s6 + $0xd8] sm:$0xff] %v1531_v40  ;;  %v1229_v43 = vadd.f32 %v1228_v42, %v1059_v41  ;;  %v982_v44 = vpop.f32.mrf.mxu0 }
 0x192   : > { %v1151_v45 = vpop.f32.mrf.mxu1 }
 0x193   : > { %v1499_v46 = vadd.f32 %v2539_v59, %v1229_v43  ;;  %v1152_v47 = vadd.f32 %v1151_v45, %v982_v44 }
 0x195   : > { %v1563_v48 = vmax.f32 %v1499_v46, 0.0  ;;  %v1468_v49 = vadd.f32 %v2539_v59, %v1152_v47 }
 0x197   : > { %1627 = vst [vmem:[%s2544_s6 + $0x1d8] sm:$0xff] %v1563_v48  ;;  %v1532_v50 = vmax.f32 %v1468_v49, 0.0  ;;  %v1062_v51 = vpop.f32.mrf.mxu2 }
 0x198   : > { %v1231_v52 = vpop.f32.mrf.mxu3 }
 0x199   : > { %1596 = vst [vmem:[%s2544_s6 + $0xe0] sm:$0xff] %v1532_v50  ;;  %v1232_v53 = vadd.f32 %v1231_v52, %v1062_v51  ;;  %v984_v54 = vpop.f32.mrf.mxu0 }
 0x19a   : > { %v1153_v55 = vpop.f32.mrf.mxu1 }
 0x19b   : > { %v1500_v56 = vadd.f32 %v2539_v59, %v1232_v53  ;;  %v1154_v57 = vadd.f32 %v1153_v55, %v984_v54 }
 0x19d   : > { %v1564_v58 = vmax.f32 %v1500_v56, 0.0  ;;  %v1469_v60 = vadd.f32 %v2539_v59, %v1154_v57 }
 0x19f   : > { %1628 = vst [vmem:[%s2544_s6 + $0x1e0] sm:$0xff] %v1564_v58  ;;  %v1533_v61 = vmax.f32 %v1469_v60, 0.0  ;;  %v1064_v62 = vpop.f32.mrf.mxu2 }
 0x1a0   : > { %v1233_v63 = vpop.f32.mrf.mxu3 }
 0x1a1   : > { %1597 = vst [vmem:[%s2544_s6 + $0xe8] sm:$0xff] %v1533_v61  ;;  %v1234_v0 = vadd.f32 %v1233_v63, %v1064_v62  ;;  %v987_v1 = vpop.f32.mrf.mxu0 }
 0x1a2   : > { %v1156_v2 = vpop.f32.mrf.mxu1 }
 0x1a3   : > { %v1501_v3 = vadd.f32 %v2539_v59, %v1234_v0  ;;  %v1157_v4 = vadd.f32 %v1156_v2, %v987_v1 }
 0x1a5   : > { %v1565_v5 = vmax.f32 %v1501_v3, 0.0  ;;  %v1470_v6 = vadd.f32 %v2539_v59, %v1157_v4 }
 0x1a7   : > { %1629 = vst [vmem:[%s2544_s6 + $0x1e8] sm:$0xff] %v1565_v5  ;;  %v1534_v7 = vmax.f32 %v1470_v6, 0.0  ;;  %v1067_v8 = vpop.f32.mrf.mxu2 }
 0x1a8   : > { %v1236_v9 = vpop.f32.mrf.mxu3 }
 0x1a9   : > { %1598 = vst [vmem:[%s2544_s6 + $0xf0] sm:$0xff] %v1534_v7  ;;  %v1237_v10 = vadd.f32 %v1236_v9, %v1067_v8  ;;  %v989_v11 = vpop.f32.mrf.mxu0 }
 0x1aa   : > { %v1158_v12 = vpop.f32.mrf.mxu1 }
 0x1ab   : > { %v1502_v13 = vadd.f32 %v2539_v59, %v1237_v10  ;;  %v1159_v14 = vadd.f32 %v1158_v12, %v989_v11 }
 0x1ad   : > { %v1566_v15 = vmax.f32 %v1502_v13, 0.0  ;;  %v1471_v16 = vadd.f32 %v2539_v59, %v1159_v14 }
 0x1af   : > { %1630 = vst [vmem:[%s2544_s6 + $0x1f0] sm:$0xff] %v1566_v15  ;;  %v1535_v17 = vmax.f32 %v1471_v16, 0.0  ;;  %v1069_v18 = vpop.f32.mrf.mxu2 }
 0x1b0   : > { %v1238_v19 = vpop.f32.mrf.mxu3 }
 0x1b1   : > { %1599 = vst [vmem:[%s2544_s6 + $0xf8] sm:$0xff] %v1535_v17  ;;  %v1239_v20 = vadd.f32 %v1238_v19, %v1069_v18 }
 0x1b3   : > { %v1503_v21 = vadd.f32 %v2539_v59, %v1239_v20 }
 0x1b5   : > { %v1567_v22 = vmax.f32 %v1503_v21, 0.0 }
 0x1b7   : > { %1631 = vst [vmem:[%s2544_s6 + $0x1f8] sm:$0xff] %v1567_v22 }
 0x1b8   : > { %2279 = shalt.err (!%p2276_p5)
}
 0x1b9   : > { %s2332_s29 = smov 128   ;;  %s2333_s4 = smov 8  }
 0x1ba   : > { %2194 = dma.vmem_to_hbm [thread:$0]  (%p2394_p4), %s1647_s18, 8192, %s1649_s19, %s1633_s15, %s2332_s29, %s2332_s29, %s2333_s4  }
 0x1bb PF: > { %p2200_p6 = scmp.ge.s32.totalorder %s2330_s17, 2  ;;  %s1663_s5 = sand.u32 1, %s2310_s12  }
 0x1bc   : > { %s1664_s6 = scalar_lea.sflag [#allocation4], %s1663_s5 }
 0x1bd   : > { %p2197_p7 = pnand %p2200_p6, %p2401_p8 }
 0x1bf   : > { %p2198_p9 = pneg %p2197_p7 }
 0x1c1   : > { %2305 = dma.done.wait (%p2198_p9), %s1664_s6, 8192  }
 0x1c2   : > { %2307 = vsyncadd (%p2198_p9), %s1664_s6, 4294959104  ;;  %s16_s17 = sadd.s32 1, %s2330_s17   ;;  %s2774_s12 = smov %s2314_s13 }
 0x1c3   : > { %p13_p10 = scmp.ge.s32.totalorder %s16_s17, 6   ;;  %s2775_s13 = smov %s2318_s14 }
 0x1c4   : > { %s2776_s14 = smov %s2407_s25  ;;  %s2777_s15 = smov %s2326_s16 }
 0x1c5   : > { %s2778_s16 = smov %s2780_s20  ;;  %15 = sbr.rel (!%p13_p10) target bundleno = 4 (0x4), region = 81 }
 0x1ca   :  { %1670 = vsyncpa [#allocation4], 1 }
 0x1cb   :  { %1672 = vsyncpa [#allocation4 + $0x1], 1 }

</bundles_post_ra>
